<compile_context>
chip_gen: v5e
topology: v5e:2x2
jax: 0.10.0
libtpu: 0.0.40
codegen_flags: <defaults>
</compile_context>

<pallas_src>
import math
import numpy as np
import jax
import jax.numpy as jnp
from jax.experimental import pallas as pl
from jax.experimental.pallas import tpu as pltpu

_TB = 8  # batch tile = one sublane group


def _make_rnn_kernel(T, TB):
    """Kernel factory; T (timesteps) and TB (sublane-aligned batch tile) are static."""

    def rnn_kernel(x_ref, wh_ref, wx_ref, wy_ref, bh_ref, by_ref, y_ref):
        # x_ref: (T, TB, D) time-major block for this batch tile; all VMEM-resident.
        D = x_ref.shape[2]
        H = wh_ref.shape[1]
        wh = wh_ref[...]                                          # (H, H)

        # ---- hoisted input projection (no sequential dependency) -----------
        # ONE (T*TB, D) @ (D, H) MXU op with bias_h folded in once.
        xp = (jnp.dot(x_ref[...].reshape(T * TB, D), wx_ref[...],
                      preferred_element_type=jnp.float32)
              + bh_ref[...])                                      # (T*TB, H)

        # ---- serial recurrence: only h @ W_h + add + tanh on the chain -----
        # Hidden states stay register-resident (T*TB*H f32 is a few vregs):
        # no VMEM scratch, no masked partial stores, no store->load round trip.
        h = jnp.zeros((TB, H), jnp.float32)
        hs = []
        for t in range(T):        # tiny static T -> full unroll; states fit in vregs
            # TODO(synk): for large T switch to lax.fori_loop(unroll=4..8) to
            # bound vreg live ranges (full unroll would spill).
            h = jnp.tanh(jnp.dot(h, wh, preferred_element_type=jnp.float32)
                         + xp[t * TB:(t + 1) * TB, :])            # aligned (TB, H) tile
            hs.append(h)

        # ---- hoisted output projection + single whole-block store ----------
        h_all = jnp.concatenate(hs, axis=0)                       # (T*TB, H) in vregs
        y = (jnp.dot(h_all, wy_ref[...], preferred_element_type=jnp.float32)
             + by_ref[...])                                       # (T*TB, H)
        y_ref[...] = y.reshape(T, TB, H).astype(y_ref.dtype)

    return rnn_kernel


def rnn_cell_forward(x_padded_btD, W_h, W_x, W_y, bias_h, bias_y):
    """One RNNCell over a zero-padded batch.

    x_padded_btD: (B, T, D) float32, zero past each sequence length.
    Returns padded outputs (B, T, H) = hidden @ W_y + bias_y per step.
    """
    B, T, D = x_padded_btD.shape
    H = W_h.shape[1]
    assert D == H, "module applies W_h/W_y to hidden; requires input_size == hidden_size"

    TB = _TB
    B_pad = ((B + TB - 1) // TB) * TB

    # Pad batch to a sublane multiple and go time-major: (T, B_pad, D).
    # (Layout glue in the wrapper; padded rows are sliced off below.)
    x_p = jnp.pad(x_padded_btD, ((0, B_pad - B), (0, 0), (0, 0)))
    x_tm = jnp.transpose(x_p, (1, 0, 2))                          # (T, B_pad, D)
    bh2 = bias_h.reshape(1, H)
    by2 = bias_y.reshape(1, H)

    y_tm = pl.pallas_call(
        _make_rnn_kernel(T, TB),
        out_shape=jax.ShapeDtypeStruct((T, B_pad, H), jnp.float32),
        grid_spec=pltpu.PrefetchScalarGridSpec(
            num_scalar_prefetch=0,
            grid=(B_pad // TB,),                                  # batch-parallel axis
            in_specs=[
                pl.BlockSpec((T, TB, D), lambda i: (0, i, 0)),    # x, batch tile
                pl.BlockSpec((D, H), lambda i: (0, 0)),           # W_h (shared)
                pl.BlockSpec((D, H), lambda i: (0, 0)),           # W_x
                pl.BlockSpec((D, H), lambda i: (0, 0)),           # W_y
                pl.BlockSpec((1, H), lambda i: (0, 0)),           # bias_h
                pl.BlockSpec((1, H), lambda i: (0, 0)),           # bias_y
            ],
            out_specs=pl.BlockSpec((T, TB, H), lambda i: (0, i, 0)),
        ),
        # Batch tiles are independent -> megacore-shardable on v7x.
        compiler_params=pltpu.CompilerParams(
            dimension_semantics=("parallel",)),
    )(x_tm, W_h, W_x, W_y, bh2, by2)

    # TODO(synk): at production T*B, stream the time axis (grid over T with a
    # carried-h scratch or pltpu.emit_pipeline) and set vmem_limit_bytes so the
    # all-resident design does not exceed v7x's 64 MiB VMEM.

    # Back to batch-first, drop batch padding (wrapper-side glue).
    return jnp.transpose(y_tm, (1, 0, 2))[:B]                     # (B, T, H)


# ---- packed-sequence / outer-Model glue (pure host-side bookkeeping) --------
# TODO(synk): PackedSequence pack/pad bookkeeping (batch_sizes/sorted_indices),
# the dataset/tokenizer pipeline, and the one-hot argmax are host glue with no
# Pallas equivalent; embedding lookup and softmax head are plain JAX ops here.
def pack_padded(padded_bth, lengths):
    """Mimics torch.nn.utils.rnn.pack_padded_sequence(batch_first=True),
    lengths assumed sorted descending."""
    rows, batch_sizes = [], []
    B, T, _ = padded_bth.shape
    for t in range(T):
        bs = int(sum(1 for l in lengths if l > t))
        if bs == 0:
            break
        batch_sizes.append(bs)
        for b in range(bs):
            rows.append(padded_bth[b, t])
    return jnp.stack(rows, axis=0), np.asarray(batch_sizes, dtype=np.int64)


def model_forward(tok_ids, lengths, emb, layers, cell_fn):
    """Model.forward: embedding -> RNN_LAYERS x RNNCell -> logits @ emb.T -> softmax.
    Works on padded tensors; invalid positions are zeroed exactly like the
    pack->pad round trips between layers do in the PyTorch module."""
    B, T = tok_ids.shape
    mask = (jnp.arange(T)[None, :, None] < lengths[:, None, None])
    h = jnp.where(mask, jnp.take(emb, tok_ids, axis=0), 0.0)      # padded embeddings
    for (W_h, W_x, W_y, b_h, b_y) in layers:
        h = cell_fn(h, W_h, W_x, W_y, b_h, b_y)
        h = jnp.where(mask, h, 0.0)                               # pack->pad round trip
    logits = h @ emb.T
    return jax.nn.softmax(logits, axis=-1)                        # (B, T, V)


def reference_forward(x_padded, W_h, W_x, W_y, bias_h, bias_y):
    """Pure-JAX reference of the PyTorch RNNCell math (padded batch)."""
    B, T, _ = x_padded.shape
    H = W_h.shape[1]
    hidden = jnp.zeros((B, H), jnp.float32)
    outs = []
    for t in range(T):
        hidden = jnp.tanh(hidden @ W_h + x_padded[:, t, :] @ W_x + bias_h)
        outs.append(hidden @ W_y + bias_y)
    return jnp.stack(outs, axis=1)                                # (B, T, H)


if __name__ == "__main__":
    # Small shapes consistent with the module: input_size == hidden_size == 32
    B, T, H = 2, 8, 32
    V = 40                                  # tiny vocab for the embedding head
    RNN_LAYERS = 2
    lengths_list = [8, 5]                   # sorted desc, as torch requires
    lengths = jnp.asarray(lengths_list, jnp.int32)

    key = jax.random.PRNGKey(0)
    k_emb, k_ids, *k_layers = jax.random.split(key, 2 + 3 * RNN_LAYERS)

    stdv = 1.0 / math.sqrt(H)
    layers = []
    for li in range(RNN_LAYERS):
        kw = k_layers[3 * li: 3 * li + 3]
        layers.append((
            jax.random.uniform(kw[0], (H, H), jnp.float32, -stdv, stdv),   # W_h
            jax.random.uniform(kw[1], (H, H), jnp.float32, -stdv, stdv),   # W_x
            jax.random.uniform(kw[2], (H, H), jnp.float32, -stdv, stdv),   # W_y
            jnp.zeros((H,), jnp.float32),                                  # bias_h
            jnp.zeros((H,), jnp.float32),                                  # bias_y
        ))
    emb = jax.random.normal(k_emb, (V, H), jnp.float32) * 0.3
    tok_ids = jax.random.randint(k_ids, (B, T), 0, V)

    # Padded first-layer input (pad_packed_sequence zero-pads past each length)
    mask = (jnp.arange(T)[None, :, None] < lengths[:, None, None])
    x0 = jnp.where(mask, jnp.take(emb, tok_ids, axis=0), 0.0)     # (B, T, H)

    # ---- single RNNCell: Pallas kernel vs. plain-JAX reference ------------
    W_h, W_x, W_y, b_h, b_y = layers[0]
    y_pallas = jax.block_until_ready(rnn_cell_forward(x0, W_h, W_x, W_y, b_h, b_y))
    y_ref = reference_forward(x0, W_h, W_x, W_y, b_h, b_y)
    np.testing.assert_allclose(np.asarray(y_pallas), np.asarray(y_ref),
                               rtol=1e-5, atol=1e-5)

    # Re-pack (glue), mimicking pack_padded_sequence on the cell output
    packed_data, batch_sizes = pack_padded(y_pallas, lengths_list)
    packed_data = jax.block_until_ready(packed_data)

    # ---- full Model forward (embedding -> 2 layers -> softmax head) -------
    probs_pallas = jax.block_until_ready(
        model_forward(tok_ids, lengths, emb, layers, rnn_cell_forward))
    probs_ref = model_forward(tok_ids, lengths, emb, layers, reference_forward)
    np.testing.assert_allclose(np.asarray(probs_pallas), np.asarray(probs_ref),
                               rtol=1e-3, atol=1e-4)

    print("KERNEL_OK")
</pallas_src>

<mosaic_0001>
module attributes {stable_mosaic.version = 11 : i64} {
  func.func @rnn_kernel(%arg0: i32, %arg1: memref<8x8x32xf32, #tpu.memory_space<vmem>>, %arg2: memref<32x32xf32, #tpu.memory_space<vmem>>, %arg3: memref<32x32xf32, #tpu.memory_space<vmem>>, %arg4: memref<32x32xf32, #tpu.memory_space<vmem>>, %arg5: memref<1x32xf32, #tpu.memory_space<vmem>>, %arg6: memref<1x32xf32, #tpu.memory_space<vmem>>, %arg7: memref<8x8x32xf32, #tpu.memory_space<vmem>>) attributes {dimension_semantics = [#tpu.dimension_semantics<parallel>], iteration_bounds = array<i64: 1>, scalar_prefetch = 0 : i64, scratch_operands = 0 : i64, tpu.core_type = #tpu.core_type<tc>, window_params = [{transform_indices = @transform_0, window_bounds = array<i64: 8, 8, 32>}, {pipeline_mode = #tpu.pipeline_mode<synchronous>, transform_indices = @transform_1, window_bounds = array<i64: 32, 32>}, {pipeline_mode = #tpu.pipeline_mode<synchronous>, transform_indices = @transform_2, window_bounds = array<i64: 32, 32>}, {pipeline_mode = #tpu.pipeline_mode<synchronous>, transform_indices = @transform_3, window_bounds = array<i64: 32, 32>}, {pipeline_mode = #tpu.pipeline_mode<synchronous>, transform_indices = @transform_4, window_bounds = array<i64: 1, 32>}, {pipeline_mode = #tpu.pipeline_mode<synchronous>, transform_indices = @transform_5, window_bounds = array<i64: 1, 32>}, {transform_indices = @transform_6, window_bounds = array<i64: 8, 8, 32>}]} {
    %c0 = arith.constant 0 : index
    %c0_0 = arith.constant 0 : index
    %0 = vector.load %arg2[%c0, %c0_0] : memref<32x32xf32, #tpu.memory_space<vmem>>, vector<32x32xf32>
    %c0_1 = arith.constant 0 : index
    %c0_2 = arith.constant 0 : index
    %c0_3 = arith.constant 0 : index
    %1 = vector.load %arg1[%c0_1, %c0_2, %c0_3] : memref<8x8x32xf32, #tpu.memory_space<vmem>>, vector<8x8x32xf32>
    %2 = vector.shape_cast %1 : vector<8x8x32xf32> to vector<64x32xf32>
    %c0_4 = arith.constant 0 : index
    %c0_5 = arith.constant 0 : index
    %3 = vector.load %arg3[%c0_4, %c0_5] : memref<32x32xf32, #tpu.memory_space<vmem>>, vector<32x32xf32>
    %cst = arith.constant dense<0.000000e+00> : vector<64x32xf32>
    %4 = tpu.matmul %2, %3, %cst {dimension_numbers = #tpu.dot_dimension_numbers<[1], [0], [0], [1], [0, 0, 1, 1], [], []>} : vector<64x32xf32>, vector<32x32xf32>, vector<64x32xf32> -> vector<64x32xf32>
    %c0_6 = arith.constant 0 : index
    %c0_7 = arith.constant 0 : index
    %5 = vector.load %arg5[%c0_6, %c0_7] : memref<1x32xf32, #tpu.memory_space<vmem>>, vector<1x32xf32>
    %6 = vector.broadcast %5 : vector<1x32xf32> to vector<64x32xf32>
    %7 = arith.addf %4, %6 : vector<64x32xf32>
    %cst_8 = arith.constant 0.000000e+00 : f32
    %8 = vector.broadcast %cst_8 : f32 to vector<8x32xf32>
    %cst_9 = arith.constant dense<0.000000e+00> : vector<8x32xf32>
    %9 = tpu.matmul %8, %0, %cst_9 {dimension_numbers = #tpu.dot_dimension_numbers<[1], [0], [0], [1], [0, 0, 1, 1], [], []>} : vector<8x32xf32>, vector<32x32xf32>, vector<8x32xf32> -> vector<8x32xf32>
    %10 = vector.extract_strided_slice %7 {offsets = [0, 0], sizes = [8, 32], strides = [1, 1]} : vector<64x32xf32> to vector<8x32xf32>
    %11 = arith.addf %9, %10 : vector<8x32xf32>
    %12 = math.tanh %11 : vector<8x32xf32>
    %cst_10 = arith.constant dense<0.000000e+00> : vector<8x32xf32>
    %13 = tpu.matmul %12, %0, %cst_10 {dimension_numbers = #tpu.dot_dimension_numbers<[1], [0], [0], [1], [0, 0, 1, 1], [], []>} : vector<8x32xf32>, vector<32x32xf32>, vector<8x32xf32> -> vector<8x32xf32>
    %14 = vector.extract_strided_slice %7 {offsets = [8, 0], sizes = [8, 32], strides = [1, 1]} : vector<64x32xf32> to vector<8x32xf32>
    %15 = arith.addf %13, %14 : vector<8x32xf32>
    %16 = math.tanh %15 : vector<8x32xf32>
    %cst_11 = arith.constant dense<0.000000e+00> : vector<8x32xf32>
    %17 = tpu.matmul %16, %0, %cst_11 {dimension_numbers = #tpu.dot_dimension_numbers<[1], [0], [0], [1], [0, 0, 1, 1], [], []>} : vector<8x32xf32>, vector<32x32xf32>, vector<8x32xf32> -> vector<8x32xf32>
    %18 = vector.extract_strided_slice %7 {offsets = [16, 0], sizes = [8, 32], strides = [1, 1]} : vector<64x32xf32> to vector<8x32xf32>
    %19 = arith.addf %17, %18 : vector<8x32xf32>
    %20 = math.tanh %19 : vector<8x32xf32>
    %cst_12 = arith.constant dense<0.000000e+00> : vector<8x32xf32>
    %21 = tpu.matmul %20, %0, %cst_12 {dimension_numbers = #tpu.dot_dimension_numbers<[1], [0], [0], [1], [0, 0, 1, 1], [], []>} : vector<8x32xf32>, vector<32x32xf32>, vector<8x32xf32> -> vector<8x32xf32>
    %22 = vector.extract_strided_slice %7 {offsets = [24, 0], sizes = [8, 32], strides = [1, 1]} : vector<64x32xf32> to vector<8x32xf32>
    %23 = arith.addf %21, %22 : vector<8x32xf32>
    %24 = math.tanh %23 : vector<8x32xf32>
    %cst_13 = arith.constant dense<0.000000e+00> : vector<8x32xf32>
    %25 = tpu.matmul %24, %0, %cst_13 {dimension_numbers = #tpu.dot_dimension_numbers<[1], [0], [0], [1], [0, 0, 1, 1], [], []>} : vector<8x32xf32>, vector<32x32xf32>, vector<8x32xf32> -> vector<8x32xf32>
    %26 = vector.extract_strided_slice %7 {offsets = [32, 0], sizes = [8, 32], strides = [1, 1]} : vector<64x32xf32> to vector<8x32xf32>
    %27 = arith.addf %25, %26 : vector<8x32xf32>
    %28 = math.tanh %27 : vector<8x32xf32>
    %cst_14 = arith.constant dense<0.000000e+00> : vector<8x32xf32>
    %29 = tpu.matmul %28, %0, %cst_14 {dimension_numbers = #tpu.dot_dimension_numbers<[1], [0], [0], [1], [0, 0, 1, 1], [], []>} : vector<8x32xf32>, vector<32x32xf32>, vector<8x32xf32> -> vector<8x32xf32>
    %30 = vector.extract_strided_slice %7 {offsets = [40, 0], sizes = [8, 32], strides = [1, 1]} : vector<64x32xf32> to vector<8x32xf32>
    %31 = arith.addf %29, %30 : vector<8x32xf32>
    %32 = math.tanh %31 : vector<8x32xf32>
    %cst_15 = arith.constant dense<0.000000e+00> : vector<8x32xf32>
    %33 = tpu.matmul %32, %0, %cst_15 {dimension_numbers = #tpu.dot_dimension_numbers<[1], [0], [0], [1], [0, 0, 1, 1], [], []>} : vector<8x32xf32>, vector<32x32xf32>, vector<8x32xf32> -> vector<8x32xf32>
    %34 = vector.extract_strided_slice %7 {offsets = [48, 0], sizes = [8, 32], strides = [1, 1]} : vector<64x32xf32> to vector<8x32xf32>
    %35 = arith.addf %33, %34 : vector<8x32xf32>
    %36 = math.tanh %35 : vector<8x32xf32>
    %cst_16 = arith.constant dense<0.000000e+00> : vector<8x32xf32>
    %37 = tpu.matmul %36, %0, %cst_16 {dimension_numbers = #tpu.dot_dimension_numbers<[1], [0], [0], [1], [0, 0, 1, 1], [], []>} : vector<8x32xf32>, vector<32x32xf32>, vector<8x32xf32> -> vector<8x32xf32>
    %38 = vector.extract_strided_slice %7 {offsets = [56, 0], sizes = [8, 32], strides = [1, 1]} : vector<64x32xf32> to vector<8x32xf32>
    %39 = arith.addf %37, %38 : vector<8x32xf32>
    %40 = math.tanh %39 : vector<8x32xf32>
    %41 = tpu.concatenate %12, %16, %20, %24, %28, %32, %36, %40 in 0 : vector<8x32xf32>, vector<8x32xf32>, vector<8x32xf32>, vector<8x32xf32>, vector<8x32xf32>, vector<8x32xf32>, vector<8x32xf32>, vector<8x32xf32> -> vector<64x32xf32>
    %c0_17 = arith.constant 0 : index
    %c0_18 = arith.constant 0 : index
    %42 = vector.load %arg4[%c0_17, %c0_18] : memref<32x32xf32, #tpu.memory_space<vmem>>, vector<32x32xf32>
    %cst_19 = arith.constant dense<0.000000e+00> : vector<64x32xf32>
    %43 = tpu.matmul %41, %42, %cst_19 {dimension_numbers = #tpu.dot_dimension_numbers<[1], [0], [0], [1], [0, 0, 1, 1], [], []>} : vector<64x32xf32>, vector<32x32xf32>, vector<64x32xf32> -> vector<64x32xf32>
    %c0_20 = arith.constant 0 : index
    %c0_21 = arith.constant 0 : index
    %44 = vector.load %arg6[%c0_20, %c0_21] : memref<1x32xf32, #tpu.memory_space<vmem>>, vector<1x32xf32>
    %45 = vector.broadcast %44 : vector<1x32xf32> to vector<64x32xf32>
    %46 = arith.addf %43, %45 : vector<64x32xf32>
    %47 = vector.shape_cast %46 : vector<64x32xf32> to vector<8x8x32xf32>
    %c0_22 = arith.constant 0 : index
    %c0_23 = arith.constant 0 : index
    %c0_24 = arith.constant 0 : index
    %48 = vector.load %arg7[%c0_22, %c0_23, %c0_24] : memref<8x8x32xf32, #tpu.memory_space<vmem>>, vector<8x8x32xf32>
    tpu.vector_store %arg7[%c0_22, %c0_23, %c0_24], %47 {strides = array<i32>} : memref<8x8x32xf32, #tpu.memory_space<vmem>>, vector<8x8x32xf32>,
    return
  }
  func.func @transform_0(%arg0: i32) -> (i32, i32, i32) {
    %c0_i32 = arith.constant 0 : i32
    %c0_i32_0 = arith.constant 0 : i32
    %c0_i32_1 = arith.constant 0 : i32
    return %c0_i32, %arg0, %c0_i32_0 : i32, i32, i32
  }
  func.func @transform_1(%arg0: i32) -> (i32, i32) {
    %c0_i32 = arith.constant 0 : i32
    %c0_i32_0 = arith.constant 0 : i32
    %c0_i32_1 = arith.constant 0 : i32
    return %c0_i32, %c0_i32_0 : i32, i32
  }
  func.func @transform_2(%arg0: i32) -> (i32, i32) {
    %c0_i32 = arith.constant 0 : i32
    %c0_i32_0 = arith.constant 0 : i32
    %c0_i32_1 = arith.constant 0 : i32
    return %c0_i32, %c0_i32_0 : i32, i32
  }
  func.func @transform_3(%arg0: i32) -> (i32, i32) {
    %c0_i32 = arith.constant 0 : i32
    %c0_i32_0 = arith.constant 0 : i32
    %c0_i32_1 = arith.constant 0 : i32
    return %c0_i32, %c0_i32_0 : i32, i32
  }
  func.func @transform_4(%arg0: i32) -> (i32, i32) {
    %c0_i32 = arith.constant 0 : i32
    %c0_i32_0 = arith.constant 0 : i32
    %c0_i32_1 = arith.constant 0 : i32
    return %c0_i32, %c0_i32_0 : i32, i32
  }
  func.func @transform_5(%arg0: i32) -> (i32, i32) {
    %c0_i32 = arith.constant 0 : i32
    %c0_i32_0 = arith.constant 0 : i32
    %c0_i32_1 = arith.constant 0 : i32
    return %c0_i32, %c0_i32_0 : i32, i32
  }
  func.func @transform_6(%arg0: i32) -> (i32, i32, i32) {
    %c0_i32 = arith.constant 0 : i32
    %c0_i32_0 = arith.constant 0 : i32
    %c0_i32_1 = arith.constant 0 : i32
    return %c0_i32, %arg0, %c0_i32_0 : i32, i32, i32
  }
}

</mosaic_0001>

<bundles_post_ra>
// kernel: tpu_custom_call.1
= control target key start
LH: loop header
LB: loop body
LE: loop exit
PB: predicated region body
PF: predicated region fallthrough
CT: control target
= control target key end

     0   :  { %11 = vsyncpa [#allocation3], 0  ;;  %s761_s0 = inlined_call_operand.hbm [shape: f32[8,8,32], index: 0, kind: input, shape index: {}]   ;;  %s762_s1 = inlined_call_operand.hbm [shape: f32[32,32], index: 1, kind: input, shape index: {}]   ;;  %s763_s2 = inlined_call_operand.hbm [shape: f32[32,32], index: 2, kind: input, shape index: {}]   ;;  %s764_s3 = inlined_call_operand.hbm [shape: f32[32,32], index: 3, kind: input, shape index: {}]   ;;  %s765_s4 = inlined_call_operand.vmem [shape: f32[1,32], index: 4, kind: input, shape index: {}]   ;;  %s766_s5 = inlined_call_operand.vmem [shape: f32[1,32], index: 5, kind: input, shape index: {}]   ;;  %s767_s6 = inlined_call_operand.hbm [shape: f32[8,8,32], index: 6, kind: output, shape index: {}]  }
   0x1   :  { %12 = vsyncpa [#allocation6], 0 }
   0x2   :  { %13 = vsyncpa [#allocation9], 0 }
   0x3   :  { %14 = vsyncpa [#allocation4], 0  ;;  %s32_s23 = sshll.u32 %s762_s1, 4  ;;  %s631_s24 = smov [#allocation5]   ;;  %s33_s23 = int_to_ptr.hbm [resolvable:$true] %s32_s23 }
   0x4   :  { %s34_s25 = sshll.u32 %s631_s24, 4  ;;  %s19_s28 = sshll.u32 %s761_s0, 4  ;;  %s35_s25 = int_to_ptr.vmem [resolvable:$true] %s34_s25  ;;  %s20_s28 = int_to_ptr.hbm [resolvable:$true] %s19_s28 }
   0x5   :  { %s632_s29 = smov 128   ;;  %s633_s30 = smov 8  }
   0x6   :  { %40 = dma.hbm_to_vmem [thread:$0]  %s33_s23, 512, %s35_s25, [#allocation6], %s632_s29, %s632_s29, %s633_s30  }
   0x7   :  { %s634_s7 = smov [#allocation2]   ;;  %s45_s1 = sshll.u32 %s763_s2, 4  ;;  %s46_s1 = int_to_ptr.hbm [resolvable:$true] %s45_s1 }
   0x8   :  { %s21_s8 = sshll.u32 %s634_s7, 4  ;;  %s58_s12 = sshll.u32 %s764_s3, 4  ;;  %s22_s8 = int_to_ptr.vmem [resolvable:$true] %s21_s8  ;;  %s59_s12 = int_to_ptr.hbm [resolvable:$true] %s58_s12 }
   0x9   :  { %27 = dma.hbm_to_vmem [thread:$0]  %s20_s28, 1024, %s22_s8, [#allocation3], %s632_s29, %s632_s29, %s633_s30  }
   0xa   :  { %s635_s13 = smov [#allocation7]   ;;  %s636_s15 = smov [#allocation8]  }
   0xb   :  { %s47_s14 = sshll.u32 %s635_s13, 4  ;;  %s60_s2 = sshll.u32 %s636_s15, 4  ;;  %s48_s14 = int_to_ptr.vmem [resolvable:$true] %s47_s14  ;;  %s61_s2 = int_to_ptr.vmem [resolvable:$true] %s60_s2 }
   0xc   :  { %53 = dma.hbm_to_vmem [thread:$0]  %s46_s1, 512, %s48_s14, [#allocation6], %s632_s29, %s632_s29, %s633_s30  }
   0xd   :  { %66 = dma.hbm_to_vmem [thread:$0]  %s59_s12, 512, %s61_s2, [#allocation9], %s632_s29, %s632_s29, %s633_s30  }
   0xe   :  { %623 = dma.done.wait [#allocation3], 1024  }
   0xf   :  { %624 = vsyncadd [#allocation3], 4294966272 }
  0x10   :  { %625 = dma.done.wait [#allocation6], 1024  }
  0x11   :  { %626 = vsyncadd [#allocation6], 4294966272 }
  0x12   :  { %627 = dma.done.wait [#allocation9], 512  }
  0x13   :  { %628 = vsyncadd [#allocation9], 4294966784  ;;  %v102_v0 = vld [vmem:[#allocation7 + $0x18] sm:$0xff]  ;;  %v101_v1 = vld [vmem:[#allocation7 + $0x10] sm:$0xff]  ;;  %vm107_vm0 = vcmask 261120   ;;  %v637_v11 = vmov 0.0  }
  0x14   :  { %469 = vmatpush.msra.mxu2 %v102_v0  ;;  %v90_v2 = vld [vmem:[#allocation5 + $0x18] sm:$0xff]  ;;  %144 = vmatpush.msra.mxu0 %v102_v0  ;;  %v100_v3 = vld [vmem:[#allocation7 + $0x8] sm:$0xff]  ;;  %v89_v4 = vld [vmem:[#allocation5 + $0x10] sm:$0xff]  ;;  %s431_s21 = sshll.u32 %s767_s6, 4  ;;  %s432_s21 = int_to_ptr.hbm [resolvable:$true] %s431_s21 }
  0x15   :  { %236 = vmatpush.msra.mxu3 %v90_v2  ;;  %260 = vmatpush.msra.mxu1 %v90_v2  ;;  %v99_v5 = vld [vmem:[#allocation7] sm:$0xff]  ;;  %v97_v6 = vld [vmem:[#allocation2 + $0x30] sm:$0xff]  ;;  %v88_v7 = vld [vmem:[#allocation5 + $0x8] sm:$0xff] }
  0x16   :  { %470 = vmatpush.msra.mxu2 %v101_v1  ;;  %145 = vmatpush.msra.mxu0 %v101_v1  ;;  %v91_v8 = vld [vmem:[#allocation2] sm:$0xff]  ;;  %v98_v10 = vld [vmem:[#allocation2 + $0x38] sm:$0xff]  ;;  %v92_v12 = vld [vmem:[#allocation2 + $0x8] sm:$0xff] }
  0x17   :  { %237 = vmatpush.msra.mxu3 %v89_v4  ;;  %261 = vmatpush.msra.mxu1 %v89_v4  ;;  %v87_v9 = vld [vmem:[#allocation5] sm:$0xff]  ;;  %v93_v21 = vld [vmem:[#allocation2 + $0x10] sm:$0xff]  ;;  %v94_v27 = vld [vmem:[#allocation2 + $0x18] sm:$0xff] }
  0x18   :  { %471 = vmatpush.msra.mxu2 %v100_v3  ;;  %146 = vmatpush.msra.mxu0 %v100_v3  ;;  %v709_v16 = vld [vmem:[%s765_s4] ss:$0 sm:$0xff]  ;;  %v368_v39 = vld [vmem:[#allocation8 + $0x18] sm:$0xff]  ;;  %v367_v40 = vld [vmem:[#allocation8 + $0x10] sm:$0xff] }
  0x19   :  { %238 = vmatpush.msra.mxu3 %v88_v7  ;;  %262 = vmatpush.msra.mxu1 %v88_v7  ;;  %v95_v33 = vld [vmem:[#allocation2 + $0x20] sm:$0xff]  ;;  %v96_v41 = vld [vmem:[#allocation2 + $0x28] sm:$0xff] }
  0x1a   :  { %472 = vmatpush.msra.mxu2 %v99_v5  ;;  %147 = vmatpush.msra.mxu0 %v99_v5  ;;  %v366_v42 = vld [vmem:[#allocation8 + $0x8] sm:$0xff]  ;;  %v365_v43 = vld [vmem:[#allocation8] sm:$0xff] }
  0x1b   :  { %452 = vmatmul.msk.f32.vlgmr.msra.gmra.mxu2 %vm107_vm0, %v97_v6  ;;  %446 = vmatmul.msk.f32.vlgmr.msra.gmra.mxu0 %vm107_vm0, %v91_v8  ;;  %v486_v53 = vld [vmem:[%s766_s5] ss:$0 sm:$0xff]  ;;  %s638_s5 = smov [#allocation10]  }
  0x1c   :  { %188 = vmatpush.msrb.mxu2 %v90_v2  ;;  %239 = vmatpush.msra.mxu3 %v87_v9  ;;  %s429_s18 = sshll.u32 %s638_s5, 4  ;;  %s430_s18 = int_to_ptr.vmem [resolvable:$true] %s429_s18 }
  0x1d   :  { %263 = vmatpush.msra.mxu1 %v87_v9 }
  0x1e   :  { %308 = vmatpush.msrb.mxu3 %v90_v2  ;;  %189 = vmatpush.msrb.mxu2 %v89_v4 }
  0x1f   :  { %332 = vmatpush.msrb.mxu1 %v90_v2 }
  0x20   :  { %309 = vmatpush.msrb.mxu3 %v89_v4  ;;  %190 = vmatpush.msrb.mxu2 %v88_v7 }
  0x21   :  { %333 = vmatpush.msrb.mxu1 %v89_v4 }
  0x22   :  { %310 = vmatpush.msrb.mxu3 %v88_v7  ;;  %191 = vmatpush.msrb.mxu2 %v87_v9 }
  0x23   :  { %334 = vmatpush.msrb.mxu1 %v88_v7  ;;  %453 = vmatmul.msk.f32.gmra.mxu2 %vm107_vm0, %v98_v10 }
  0x24   :  { %311 = vmatpush.msrb.mxu3 %v87_v9  ;;  %212 = vmatpush.msra.mxu2 %v90_v2 }
  0x25   :  { %335 = vmatpush.msrb.mxu1 %v87_v9  ;;  %447 = vmatmul.msk.f32.gmra.mxu0 %vm107_vm0, %v92_v12 }
  0x26   :  { %213 = vmatpush.msra.mxu2 %v89_v4 }
  0x28   :  { %214 = vmatpush.msra.mxu2 %v88_v7 }
  0x2a   :  { %215 = vmatpush.msra.mxu2 %v87_v9 }
  0x2b   :  { %192 = vmatmul.f32.vlgmr.msrb.gmra.mxu2 %v637_v11 }
  0x2c   :  { %284 = vmatpush.msrb.mxu2 %v90_v2 }
  0x2d   :  { %448 = vmatmul.msk.f32.gmra.mxu0 %vm107_vm0, %v93_v21 }
  0x2e   :  { %285 = vmatpush.msrb.mxu2 %v89_v4 }
  0x30   :  { %286 = vmatpush.msrb.mxu2 %v88_v7 }
  0x32   :  { %287 = vmatpush.msrb.mxu2 %v87_v9 }
  0x35   :  { %449 = vmatmul.msk.f32.gmra.mxu0 %vm107_vm0, %v94_v27 }
  0x3d   :  { %450 = vmatmul.msk.f32.gmra.mxu0 %vm107_vm0, %v95_v33 }
  0x45   :  { %451 = vmatmul.msk.f32.gmra.mxu0 %vm107_vm0, %v96_v41 }
  0x98   :  { %v149_v15 = vpop.f32.mrf.mxu0 }
  0x99   :  { %v150_v17 = vadd.f32 %v709_v16, %v149_v15 }
  0x9e   :  { %v702_v13 = vpop.f32.mrf.mxu2 }
  0x9f   :  { %v168_v57 = vadd.f32 %v709_v16, %v702_v13 }
  0xa2   :  { %v152_v22 = vpop.f32.mrf.mxu0 }
  0xa3   :  { %v153_v23 = vadd.f32 %v709_v16, %v152_v22 }
  0xa6   :  { %v704_v14 = vpop.f32.mrf.mxu2 }
  0xaa   :  { %v155_v28 = vpop.f32.mrf.mxu0 }
  0xab   :  { %v156_v29 = vadd.f32 %v709_v16, %v155_v28 }
  0xae   :  { %v193_v18 = vpop.f32.mrf.mxu2 }
  0xaf   :  { %v194_v19 = vadd.f32 %v193_v18, %v150_v17 }
  0xb1   :  { %487 = vtanh.f32 %v194_v19 }
  0xb2   :  { %v158_v34 = vpop.f32.mrf.mxu0 }
  0xb3   :  { %v159_v35 = vadd.f32 %v709_v16, %v158_v34 }
  0xb7   :  { %v712_v20 = vpop.eup %487 }
  0xb8   :  { %454 = vmatmul.msk.f32.vlgmr.msra.gmra.mxu2 %vm107_vm0, %v712_v20 }
  0xb9   :  { %356 = vmatpush.msra.mxu2 %v90_v2 }
  0xba   :  { %v161_v44 = vpop.f32.mrf.mxu0 }
  0xbb   :  { %357 = vmatpush.msra.mxu2 %v89_v4  ;;  %v162_v45 = vadd.f32 %v709_v16, %v161_v44 }
  0xbd   :  { %358 = vmatpush.msra.mxu2 %v88_v7  ;;  %v171_v7 = vadd.f32 %v709_v16, %v704_v14 }
  0xbf   :  { %359 = vmatpush.msra.mxu2 %v87_v9 }
  0xc2   :  { %v164_v49 = vpop.f32.mrf.mxu0 }
  0xc3   :  { %v165_v50 = vadd.f32 %v709_v16, %v164_v49 }
 0x13b   :  { %v217_v24 = vpop.f32.mrf.mxu2 }
 0x13c   :  { %v218_v25 = vadd.f32 %v217_v24, %v153_v23 }
 0x13e   :  { %489 = vtanh.f32 %v218_v25 }
 0x144   :  { %v490_v26 = vpop.eup %489 }
 0x145   :  { %455 = vmatmul.msk.f32.vlgmr.msra.gmra.mxu3 %vm107_vm0, %v490_v26 }
 0x146   :  { %473 = vmatpush.msra.mxu3 %v368_v39 }
 0x148   :  { %474 = vmatpush.msra.mxu3 %v367_v40 }
 0x14a   :  { %475 = vmatpush.msra.mxu3 %v366_v42 }
 0x14c   :  { %476 = vmatpush.msra.mxu3 %v365_v43 }
 0x1c8   :  { %v241_v30 = vpop.f32.mrf.mxu3 }
 0x1c9   :  { %v242_v31 = vadd.f32 %v241_v30, %v156_v29 }
 0x1cb   :  { %491 = vtanh.f32 %v242_v31 }
 0x1d1   :  { %v492_v32 = vpop.eup %491 }
 0x1d2   :  { %456 = vmatmul.msk.f32.vlgmr.msra.gmra.mxu1 %vm107_vm0, %v492_v32 }
 0x1d3   :  { %388 = vmatpush.msra.mxu1 %v368_v39 }
 0x1d5   :  { %389 = vmatpush.msra.mxu1 %v367_v40 }
 0x1d7   :  { %390 = vmatpush.msra.mxu1 %v366_v42 }
 0x1d9   :  { %391 = vmatpush.msra.mxu1 %v365_v43 }
 0x24f   :  { %v265_v36 = vpop.f32.mrf.mxu1 }
 0x250   :  { %v266_v37 = vadd.f32 %v265_v36, %v159_v35 }
 0x252   :  { %493 = vtanh.f32 %v266_v37 }
 0x258   :  { %v494_v38 = vpop.eup %493 }
 0x259   :  { %457 = vmatmul.msk.f32.vlgmr.msrb.gmra.mxu2 %vm107_vm0, %v494_v38 }
 0x2dc   :  { %v289_v46 = vpop.f32.mrf.mxu2 }
 0x2dd   :  { %v290_v47 = vadd.f32 %v289_v46, %v162_v45 }
 0x2df   :  { %495 = vtanh.f32 %v290_v47 }
 0x2e5   :  { %v496_v48 = vpop.eup %495 }
 0x2e6   :  { %458 = vmatmul.msk.f32.vlgmr.msrb.gmra.mxu3 %vm107_vm0, %v496_v48 }
 0x2ee   :  { %465 = vmatmul.msk.f32.vlgmr.msra.gmra.mxu3 %vm107_vm0, %v496_v48 }
 0x369   :  { %v313_v51 = vpop.f32.mrf.mxu3 }
 0x36a   :  { %v314_v52 = vadd.f32 %v313_v51, %v165_v50 }
 0x36c   :  { %497 = vtanh.f32 %v314_v52 }
 0x371   :  { %v405_v54 = vpop.f32.mrf.mxu3 }
 0x372   :  { %v498_v55 = vpop.eup %497  ;;  %v406_v56 = vadd.f32 %v486_v53, %v405_v54 }
 0x373   :  { %459 = vmatmul.msk.f32.vlgmr.msrb.gmra.mxu1 %vm107_vm0, %v498_v55  ;;  %466 = vmatmul.msk.f32.gmra.mxu3 %vm107_vm0, %v498_v55 }
 0x374   :  { %421 = vst.msk [vmem:[#allocation10 + $0x20] sm:$0xff] %vm107_vm0, %v406_v56 }
 0x37b   :  { %461 = vmatmul.msk.f32.vlgmr.msra.gmra.mxu1 %vm107_vm0, %v712_v20 }
 0x383   :  { %462 = vmatmul.msk.f32.gmra.mxu1 %vm107_vm0, %v490_v26 }
 0x38b   :  { %463 = vmatmul.msk.f32.gmra.mxu1 %vm107_vm0, %v492_v32 }
 0x393   :  { %464 = vmatmul.msk.f32.gmra.mxu1 %vm107_vm0, %v494_v38 }
 0x3f0   :  { %v337_v58 = vpop.f32.mrf.mxu1 }
 0x3f1   :  { %v338_v59 = vadd.f32 %v337_v58, %v168_v57 }
 0x3f3   :  { %499 = vtanh.f32 %v338_v59 }
 0x3f6   :  { %v408_v60 = vpop.f32.mrf.mxu3 }
 0x3f7   :  { %v409_v61 = vadd.f32 %v486_v53, %v408_v60 }
 0x3f8   :  { %v393_v62 = vpop.f32.mrf.mxu1 }
 0x3f9   :  { %v500_v63 = vpop.eup %499  ;;  %422 = vst.msk [vmem:[#allocation10 + $0x28] sm:$0xff] %vm107_vm0, %v409_v61  ;;  %v394_v0 = vadd.f32 %v486_v53, %v393_v62 }
 0x3fa   :  { %460 = vmatmul.msk.f32.vlgmr.msra.gmra.mxu2 %vm107_vm0, %v500_v63  ;;  %467 = vmatmul.msk.f32.gmra.mxu3 %vm107_vm0, %v500_v63 }
 0x3fb   :  { %417 = vst.msk [vmem:[#allocation10] sm:$0xff] %vm107_vm0, %v394_v0 }
 0x400   :  { %v396_v1 = vpop.f32.mrf.mxu1 }
 0x401   :  { %v397_v2 = vadd.f32 %v486_v53, %v396_v1 }
 0x403   :  { %418 = vst.msk [vmem:[#allocation10 + $0x8] sm:$0xff] %vm107_vm0, %v397_v2 }
 0x408   :  { %v399_v3 = vpop.f32.mrf.mxu1 }
 0x409   :  { %v400_v4 = vadd.f32 %v486_v53, %v399_v3 }
 0x40b   :  { %419 = vst.msk [vmem:[#allocation10 + $0x10] sm:$0xff] %vm107_vm0, %v400_v4 }
 0x410   :  { %v402_v5 = vpop.f32.mrf.mxu1 }
 0x411   :  { %v403_v6 = vadd.f32 %v486_v53, %v402_v5 }
 0x413   :  { %420 = vst.msk [vmem:[#allocation10 + $0x18] sm:$0xff] %vm107_vm0, %v403_v6 }
 0x47d   :  { %v361_v8 = vpop.f32.mrf.mxu2  ;;  %v411_v9 = vpop.f32.mrf.mxu3 }
 0x47e   :  { %v362_v10 = vadd.f32 %v361_v8, %v171_v7  ;;  %v412_v11 = vadd.f32 %v486_v53, %v411_v9 }
 0x480   :  { %501 = vtanh.f32 %v362_v10  ;;  %423 = vst.msk [vmem:[#allocation10 + $0x30] sm:$0xff] %vm107_vm0, %v412_v11 }
 0x486   :  { %v502_v12 = vpop.eup %501 }
 0x487   :  { %468 = vmatmul.msk.f32.gmra.mxu3 %vm107_vm0, %v502_v12 }
 0x50a   :  { %v414_v13 = vpop.f32.mrf.mxu3 }
 0x50b   :  { %v415_v15 = vadd.f32 %v486_v53, %v414_v13 }
 0x50d   :  { %424 = vst.msk [vmem:[#allocation10 + $0x38] sm:$0xff] %vm107_vm0, %v415_v15 }
 0x50e   :  { %437 = dma.vmem_to_hbm [thread:$0]  %s430_s18, 1024, %s432_s21, [#allocation4], %s632_s29, %s632_s29, %s633_s30  }
 0x50f   :  { %629 = dma.done.wait [#allocation4], 1024  }
 0x510   :  { %630 = vsyncadd [#allocation4], 4294966272 }
 0x511   :  { %442 = vsyncpa [#allocation3], 1 }
 0x512   :  { %443 = vsyncpa [#allocation6], 1 }
 0x513   :  { %444 = vsyncpa [#allocation9], 1 }
 0x514   :  { %445 = vsyncpa [#allocation4], 1 }

</bundles_post_ra>
